<compile_context>
chip_gen: v5e
topology: v5e:2x2
jax: 0.10.0
libtpu: 0.0.40
codegen_flags: <defaults>
</compile_context>

<pallas_src>
import math

import jax
import jax.numpy as jnp
from jax.experimental import pallas as pl
from jax.experimental.pallas import tpu as pltpu

_LANES = 128                  # voxels per row of the flattened stream
_DEFAULT_BLOCK_ROWS = 2048    # 2048 rows * 128 voxels ~= 5 MB per grid step


def _md_kernel(sel_ref, ev_ref, mask_ref, out_ref):
    """One grid step: BR rows of 128 voxels.

    sel_ref  : (K*128, 128) constant 0/1 selection matrix (VMEM-resident)
    ev_ref   : (BR, K*128)  interleaved eigenvalues, natural memory order
    mask_ref : (BR, 128)    one mask value per voxel
    out_ref  : (BR, 128)    md * mask
    """
    k = ev_ref.shape[1] // out_ref.shape[1]

    ev = ev_ref[...]
    if ev.dtype != jnp.float32:          # skip redundant casts when already f32
        ev = ev.astype(jnp.float32)

    # Un-interleave + sum the K eigenvalues of each voxel in one MXU op:
    #   sums[r, v] = sum_e ev[r, v*K + e]
    sums = jnp.dot(ev, sel_ref[...], preferred_element_type=jnp.float32)

    m = mask_ref[...]
    if m.dtype != jnp.float32:
        m = m.astype(jnp.float32)

    res = sums * (1.0 / k) * m           # mean = sum / K, then apply mask
    if res.dtype != out_ref.dtype:
        res = res.astype(out_ref.dtype)
    out_ref[...] = res


def md_module(eigenvals, mask, *, block_rows=_DEFAULT_BLOCK_ROWS):
    """md = eigenvals.mean(-1, keepdims=True) * mask  (MDModule semantics)."""
    lead = eigenvals.shape[:-1]
    k = eigenvals.shape[-1]
    n = math.prod(lead)

    # Only materialize the broadcast if the caller passed a reduced mask shape;
    # for the module's full (..., 1) mask this branch is never taken.
    if mask.shape != lead + (1,):
        mask = jnp.broadcast_to(mask, lead + (1,))

    # Free (layout-preserving) reshapes -- no transpose, no extra HBM pass.
    ev_flat = eigenvals.reshape(n * k)
    mk_flat = mask.reshape(n)
    pad = (-n) % _LANES
    if pad:  # only when the voxel count is not 128-aligned (one-off small copy)
        ev_flat = jnp.pad(ev_flat, (0, pad * k))
        mk_flat = jnp.pad(mk_flat, (0, pad))
    n_pad = n + pad
    g = n_pad // _LANES                        # rows of 128 voxels
    ev2 = ev_flat.reshape(g, k * _LANES)       # interleaved, lane-dense
    mk2 = mk_flat.reshape(g, _LANES)

    # Constant 0/1 selection matrix: column v sums lanes v*K .. v*K + K-1.
    sel = (jnp.arange(k * _LANES, dtype=jnp.int32)[:, None] // k
           == jnp.arange(_LANES, dtype=jnp.int32)[None, :]).astype(jnp.float32)

    br = min(block_rows, g)                    # block rows (full dim if small)
    grid = (pl.cdiv(g, br),)

    itemsize = jnp.dtype(eigenvals.dtype).itemsize
    cost = pl.CostEstimate(
        flops=2 * k * _LANES * n_pad + n_pad,  # selection matmul + mask mul
        transcendentals=0,
        bytes_accessed=(k * itemsize + jnp.dtype(mask.dtype).itemsize
                        + itemsize) * n_pad + sel.size * 4,
    )

    out = pl.pallas_call(
        _md_kernel,
        out_shape=jax.ShapeDtypeStruct((g, _LANES), eigenvals.dtype),
        grid=grid,
        in_specs=[
            pl.BlockSpec((k * _LANES, _LANES), lambda i: (0, 0)),  # sel: resident
            pl.BlockSpec((br, k * _LANES), lambda i: (i, 0)),      # eigenvalues
            pl.BlockSpec((br, _LANES), lambda i: (i, 0)),          # mask
        ],
        out_specs=pl.BlockSpec((br, _LANES), lambda i: (i, 0)),
        compiler_params=pltpu.CompilerParams(
            dimension_semantics=("parallel",)),   # shard rows across TCs (v7x)
        cost_estimate=cost,
    )(sel, ev2, mk2)

    md = out.reshape(n_pad)
    if pad:
        md = md[:n]
    return md.reshape(lead + (1,))


if __name__ == "__main__":
    key = jax.random.PRNGKey(0)
    k1, k2 = jax.random.split(key)

    # Small DTI-like volume: batch=2, 4x16x16 voxels, 3 eigenvalues per voxel.
    eigenvals = jax.random.uniform(k1, (2, 4, 16, 16, 3), dtype=jnp.float32)
    mask = (jax.random.uniform(k2, (2, 4, 16, 16, 1)) > 0.3).astype(jnp.float32)

    ref = jnp.mean(eigenvals, axis=-1, keepdims=True) * mask

    # Exercise both the multi-block pipelined path (grid=(2,), "parallel")
    # and the single-block path used when the volume fits one block.
    md_tiled = md_module(eigenvals, mask, block_rows=8)
    md_full = md_module(eigenvals, mask)
    jax.block_until_ready((md_tiled, md_full))

    assert md_tiled.shape == ref.shape and md_full.shape == ref.shape
    # Tolerance comfortably covers a worst-case bf16-input MXU pass; observed
    # error with the f32 selection matmul is at f32 round-off level.
    assert jnp.allclose(md_tiled, ref, rtol=5e-3, atol=1e-5), "mismatch (tiled)"
    assert jnp.allclose(md_full, ref, rtol=5e-3, atol=1e-5), "mismatch (full)"

    print("KERNEL_OK")
</pallas_src>

<mosaic_0001>
module attributes {stable_mosaic.version = 11 : i64} {
  func.func @_md_kernel(%arg0: i32, %arg1: memref<384x128xf32, #tpu.memory_space<vmem>>, %arg2: memref<8x384xf32, #tpu.memory_space<vmem>>, %arg3: memref<8x128xf32, #tpu.memory_space<vmem>>, %arg4: memref<8x128xf32, #tpu.memory_space<vmem>>) attributes {dimension_semantics = [#tpu.dimension_semantics<parallel>], iteration_bounds = array<i64: 2>, scalar_prefetch = 0 : i64, scratch_operands = 0 : i64, tpu.core_type = #tpu.core_type<tc>, window_params = [{pipeline_mode = #tpu.pipeline_mode<synchronous>, transform_indices = @transform_0, window_bounds = array<i64: 384, 128>}, {transform_indices = @transform_1, window_bounds = array<i64: 8, 384>}, {transform_indices = @transform_2, window_bounds = array<i64: 8, 128>}, {transform_indices = @transform_3, window_bounds = array<i64: 8, 128>}]} {
    %c0 = arith.constant 0 : index
    %c0_0 = arith.constant 0 : index
    %0 = vector.load %arg2[%c0, %c0_0] : memref<8x384xf32, #tpu.memory_space<vmem>>, vector<8x384xf32>
    %c0_1 = arith.constant 0 : index
    %c0_2 = arith.constant 0 : index
    %1 = vector.load %arg1[%c0_1, %c0_2] : memref<384x128xf32, #tpu.memory_space<vmem>>, vector<384x128xf32>
    %cst = arith.constant dense<0.000000e+00> : vector<8x128xf32>
    %2 = tpu.matmul %0, %1, %cst {dimension_numbers = #tpu.dot_dimension_numbers<[1], [0], [0], [1], [0, 0, 1, 1], [], []>} : vector<8x384xf32>, vector<384x128xf32>, vector<8x128xf32> -> vector<8x128xf32>
    %c0_3 = arith.constant 0 : index
    %c0_4 = arith.constant 0 : index
    %3 = vector.load %arg3[%c0_3, %c0_4] : memref<8x128xf32, #tpu.memory_space<vmem>>, vector<8x128xf32>
    %cst_5 = arith.constant 0.333333343 : f32
    %4 = vector.broadcast %cst_5 : f32 to vector<8x128xf32>
    %5 = arith.mulf %2, %4 : vector<8x128xf32>
    %6 = arith.mulf %5, %3 : vector<8x128xf32>
    %c0_6 = arith.constant 0 : index
    %c0_7 = arith.constant 0 : index
    %7 = vector.load %arg4[%c0_6, %c0_7] : memref<8x128xf32, #tpu.memory_space<vmem>>, vector<8x128xf32>
    tpu.vector_store %arg4[%c0_6, %c0_7], %6 {strides = array<i32>} : memref<8x128xf32, #tpu.memory_space<vmem>>, vector<8x128xf32>,
    return
  }
  func.func @transform_0(%arg0: i32) -> (i32, i32) {
    %c0_i32 = arith.constant 0 : i32
    %c0_i32_0 = arith.constant 0 : i32
    %c0_i32_1 = arith.constant 0 : i32
    return %c0_i32, %c0_i32_0 : i32, i32
  }
  func.func @transform_1(%arg0: i32) -> (i32, i32) {
    %c0_i32 = arith.constant 0 : i32
    %c0_i32_0 = arith.constant 0 : i32
    return %arg0, %c0_i32 : i32, i32
  }
  func.func @transform_2(%arg0: i32) -> (i32, i32) {
    %c0_i32 = arith.constant 0 : i32
    %c0_i32_0 = arith.constant 0 : i32
    return %arg0, %c0_i32 : i32, i32
  }
  func.func @transform_3(%arg0: i32) -> (i32, i32) {
    %c0_i32 = arith.constant 0 : i32
    %c0_i32_0 = arith.constant 0 : i32
    return %arg0, %c0_i32 : i32, i32
  }
}

</mosaic_0001>

<bundles_post_ra>
// kernel: tpu_custom_call.1
= control target key start
LH: loop header
LB: loop body
LE: loop exit
PB: predicated region body
PF: predicated region fallthrough
CT: control target
= control target key end

     0   :  { %s917_s0 = inlined_call_operand.hbm [shape: f32[384,128], index: 0, kind: input, shape index: {}]   ;;  %s918_s1 = inlined_call_operand.hbm [shape: f32[16,384], index: 1, kind: input, shape index: {}]   ;;  %s919_s2 = inlined_call_operand.hbm [shape: f32[16,128], index: 2, kind: input, shape index: {}]   ;;  %s920_s3 = inlined_call_operand.hbm [shape: f32[16,128], index: 3, kind: output, shape index: {}]  }
   0x1   :  { %921 = sst [smem:[#allocation12_spill]] %s917_s0 }
   0x2   :  { %8 = vsyncpa [#allocation3], 0 }
   0x3   :  { %9 = vsyncpa [#allocation6], 0 }
   0x4   :  { %11 = vsyncpa [#allocation6 + $0x1], 0 }
   0x5   :  { %12 = vsyncpa [#allocation4], 0 }
   0x6   :  { %14 = vsyncpa [#allocation4 + $0x1], 0  ;;  %s742_s12 = smov 0   ;;  %s744_s13 = smov 0  }
   0x7   :  { %s746_s14 = smov 0   ;;  %s748_s15 = smov 0  }
   0x8 LB: > { %s763_s16 = sadd.s32 4294967295, %s717_s15   ;;  %s475_s17 = sadd.s32 4294967294, %s717_s15   ;;  %s717_s15 = sphi %s748_s15, %s932_s15   ;;  %s713_s14 = sphi %s746_s14, %s931_s14   ;;  %s709_s13 = sphi %s744_s13, %s930_s13   ;;  %s705_s12 = sphi %s742_s12, %s929_s12  }
   0x9   : > { %s767_s18 = sadd.s32 1, %s717_s15   ;;  %s48_s19 = sadd.s32 1, %s713_s14 }
   0xa   : > { %s45_s20 = ssub.s32 %s717_s15, %s767_s18  ;;  %p55_p0 = scmp.ne.s32.totalorder %s713_s14, %s709_s13 }
   0xb   : > { %p46_p1 = scmp.eq.s32.totalorder %s45_s20, 0  ;;  %p56_p2 = scmp.eq.s32.totalorder %s717_s15, 0 }
   0xc   : > { %p61_p3 = scmp.ne.s32.totalorder %s709_s13, %s705_s12  ;;  %p111_p4 = scmp.eq.s32.totalorder %s763_s16, 1 }
   0xd   : > { %s779_s21 = scalar_select %p46_p1, %s713_s14, %s48_s19  }
   0xe   : > { %p57_p5 = por %p56_p2, %p55_p0  ;;  %p781_p6 = por %p111_p4, %p55_p0 }
   0xf   : > { %p117_p7 = scmp.eq.s32.totalorder %s475_s17, 1  ;;  %p519_p9 = scmp.lt.s32.totalorder %s717_s15, 2 }
  0x10   : > { %s151_s24 = sand.u32 1, %s717_s15   ;;  %s153_s25 = sand.u32 1, %s713_s14  }
  0x11   : > { %p790_p10 = por %p117_p7, %p61_p3  ;;  %s490_s26 = smul.u32 24, %s153_s25 }
  0x12   : > { %p798_p11 = pnand %p519_p9, %p57_p5  ;;  %s491_s28 = smul.u32 24, %s717_s15 }
  0x13   : > { %p62_p12 = scmp.eq.s32.totalorder %s763_s16, 0  ;;  %s155_s5 = scalar_lea.vmem [#allocation5], %s490_s26 }
  0x14   : > { %s160_s4 = scalar_lea.hbm %s918_s1, %s491_s28  ;;  %s164_s6 = sshll.u32 %s155_s5, 4  ;;  %s165_s6 = int_to_ptr.vmem [resolvable:$true] %s164_s6 }
  0x15   : > { %s162_s7 = sshll.u32 %s160_s4, 4  ;;  %p812_p13 = por %p62_p12, %p61_p3  ;;  %s163_s7 = int_to_ptr.hbm [resolvable:$true] %s162_s7 }
  0x16   : > { %s816_s9 = scalar_lea.sflag [#allocation6], %s151_s24  ;;  %s557_s10 = sshra.s32 %s163_s7, 4  ;;  %s558_s10 = int_to_ptr.hbm [resolvable:$true] %s557_s10 }
  0x17   : > { %s559_s11 = scalar_lea.hbm %s558_s10, 24  ;;  %p561_p1 = pneg %p798_p11 }
  0x18   : > { %p560_p0 = scmp.ne.s32.totalorder %s558_s10, %s559_s11  ;;  %s564_s20 = scalar_lea.hbm %s918_s1, 48 }
  0x19   : > { %p565_p3 = scmp.lt.s32.totalorder %s558_s10, %s918_s1  ;;  %p566_p5 = scmp.lt.s32.totalorder %s564_s20, %s559_s11 }
  0x1a   : > { %p562_p2 = pnand %p561_p1, %p560_p0 }
  0x1b   : > { %p567_p7 = por %p566_p5, %p565_p3 }
  0x1c   : > { %p563_p4 = pneg %p562_p2 }
  0x1e   : > { %p568_p9 = pnand %p567_p7, %p563_p4 }
  0x20   : > { %571 = shalt.err (!%p568_p9)
}
  0x21   : > { %510 = dma.hbm_to_vmem [thread:$0]  (!%p798_p11), %s163_s7, 384, %s165_s6, %s816_s9  }
  0x22   : > { %p476_p0 = scmp.ge.s32.totalorder %s717_s15, 1  ;;  %p124_p2 = scmp.lt.s32.totalorder %s717_s15, 3 }
  0x23   : > { %s926_s0 = sld [smem:[#allocation12_spill]]  ;;  %s719_s5 = smov [#allocation2]  }
  0x24   : > { %p837_p8 = pnand %p476_p0, %p124_p2  ;;  %s137_s10 = sshll.u32 %s719_s5, 4  ;;  %s138_s10 = int_to_ptr.vmem [resolvable:$true] %s137_s10 }
  0x25   : > { %s480_s11 = sshll.u32 %s153_s25, 3  ;;  %s481_s6 = sshll.u32 %s717_s15, 3 }
  0x26   : > { %p503_p4 = pneg %p837_p8  ;;  %s175_s7 = scalar_lea.vmem [#allocation7], %s480_s11 }
  0x27   : > { %s183_s17 = sshll.u32 %s175_s7, 4  ;;  %s179_s26 = scalar_lea.hbm %s919_s2, %s481_s6  ;;  %s184_s17 = int_to_ptr.vmem [resolvable:$true] %s183_s17 }
  0x28   : > { %p504_p3 = pnand %p503_p4, %p62_p12  ;;  %s720_s28 = smov 128  }
  0x29   : > { %s135_s30 = sshll.u32 %s926_s0, 4  ;;  %s721_s24 = smov 8   ;;  %s136_s30 = int_to_ptr.hbm [resolvable:$true] %s135_s30 }
  0x2a   : > { %506 = dma.hbm_to_vmem [thread:$0]  (!%p504_p3), %s136_s30, 6144, %s138_s10, [#allocation3], %s720_s28, %s720_s28, %s721_s24  }
  0x2b   : > { %s181_s29 = sshll.u32 %s179_s26, 4  ;;  %s624_s7 = scalar_lea.hbm %s919_s2, 16  ;;  %s182_s29 = int_to_ptr.hbm [resolvable:$true] %s181_s29 }
  0x2c   : > { %s617_s5 = sshra.s32 %s182_s29, 4  ;;  %s618_s5 = int_to_ptr.hbm [resolvable:$true] %s617_s5 }
  0x2d   : > { %s619_s0 = scalar_lea.hbm %s618_s5, 8  ;;  %p625_p0 = scmp.lt.s32.totalorder %s618_s5, %s919_s2 }
  0x2e   : > { %p620_p5 = scmp.ne.s32.totalorder %s618_s5, %s619_s0  ;;  %p626_p2 = scmp.lt.s32.totalorder %s624_s7, %s619_s0 }
  0x30   : > { %p622_p7 = pnand %p620_p5, %p561_p1  ;;  %p627_p4 = por %p626_p2, %p625_p0 }
  0x32   : > { %p623_p9 = pneg %p622_p7 }
  0x34   : > { %p628_p3 = pnand %p627_p4, %p623_p9 }
  0x36   : > { %631 = shalt.err (!%p628_p3)
}
  0x37   : > { %513 = dma.hbm_to_vmem [thread:$0]  (!%p798_p11), %s182_s29, 128, %s184_s17, %s816_s9  }
  0x38   : > { %192 = sbr.rel (%p837_p8) target bundleno = 240 (0xf0), region = 32 }
  0x3d   : > { %692 = dma.done.wait (%p62_p12), [#allocation3], 6144  }
  0x3e   : > { %694 = vsyncadd (%p62_p12), [#allocation3], 4294961152  ;;  %s199_s0 = sand.u32 1, %s763_s16   ;;  %s871_s30 = sand.u32 1, %s709_s13  }
  0x3f   : > { %s492_s10 = smul.u32 24, %s871_s30  ;;  %s200_s27 = scalar_lea.sflag [#allocation6], %s199_s0 }
  0x41   : > { %s874_s20 = scalar_lea.vmem [#allocation5], %s492_s10 }
  0x42   : > { %696 = dma.done.wait (%p812_p13), %s200_s27, 512  }
  0x43   : > { %698 = vsyncadd (%p812_p13), %s200_s27, 4294966784  ;;  %v292_v0 = vld [vmem:[#allocation2 + $0x178] sm:$0xff]  ;;  %v291_v1 = vld [vmem:[#allocation2 + $0x170] sm:$0xff]  ;;  %s484_s8 = sshll.u32 %s871_s30, 3  ;;  %s487_s9 = sshll.u32 %s763_s16, 3 }
  0x44   : > { %v260_v2 = vld [vmem:[#allocation2 + $0x78] sm:$0xff]  ;;  %333 = vmatpush.msra.mxu2 %v292_v0  ;;  %v259_v4 = vld [vmem:[#allocation2 + $0x70] sm:$0xff]  ;;  %v290_v5 = vld [vmem:[#allocation2 + $0x168] sm:$0xff]  ;;  %s368_s26 = scalar_lea.hbm %s920_s3, %s487_s9  ;;  %s213_s28 = scalar_lea.vmem [#allocation7], %s484_s8 }
  0x45   : > { %293 = vmatpush.msra.mxu0 %v260_v2  ;;  %v276_v3 = vld [vmem:[#allocation2 + $0xf8] sm:$0xff]  ;;  %v275_v6 = vld [vmem:[#allocation2 + $0xf0] sm:$0xff]  ;;  %v258_v7 = vld [vmem:[#allocation2 + $0x68] sm:$0xff]  ;;  %s241_s24 = scalar_lea.vmem [#allocation8], %s484_s8  ;;  %s372_s5 = sshll.u32 %s368_s26, 4  ;;  %s373_s5 = int_to_ptr.hbm [resolvable:$true] %s372_s5 }
  0x46   : > { %313 = vmatpush.msra.mxu1 %v276_v3  ;;  %334 = vmatpush.msra.mxu2 %v291_v1  ;;  %v274_v8 = vld [vmem:[#allocation2 + $0xe8] sm:$0xff]  ;;  %v289_v9 = vld [vmem:[#allocation2 + $0x160] sm:$0xff]  ;;  %v288_v12 = vld [vmem:[#allocation2 + $0x158] sm:$0xff]  ;;  %s370_s29 = sshll.u32 %s241_s24, 4  ;;  %s358_s25 = scalar_lea.sflag [#allocation4], %s871_s30  ;;  %s371_s29 = int_to_ptr.vmem [resolvable:$true] %s370_s29 }
  0x47   : > { %294 = vmatpush.msra.mxu0 %v259_v4  ;;  %v257_v10 = vld [vmem:[#allocation2 + $0x60] sm:$0xff]  ;;  %v256_v13 = vld [vmem:[#allocation2 + $0x58] sm:$0xff]  ;;  %v287_v15 = vld [vmem:[#allocation2 + $0x150] sm:$0xff]  ;;  %s661_s16 = sshra.s32 %s373_s5, 4  ;;  %s667_s6 = scalar_lea.hbm %s920_s3, 16  ;;  %s662_s16 = int_to_ptr.hbm [resolvable:$true] %s661_s16 }
  0x48   : > { %314 = vmatpush.msra.mxu1 %v275_v6  ;;  %335 = vmatpush.msra.mxu2 %v290_v5  ;;  %v273_v11 = vld [vmem:[#allocation2 + $0xe0] sm:$0xff]  ;;  %v272_v14 = vld [vmem:[#allocation2 + $0xd8] sm:$0xff]  ;;  %v255_v16 = vld [vmem:[#allocation2 + $0x50] sm:$0xff]  ;;  %s663_s11 = scalar_lea.hbm %s662_s16, 8  ;;  %p668_p13 = scmp.lt.s32.totalorder %s662_s16, %s920_s3 }
  0x49   : > { %295 = vmatpush.msra.mxu0 %v258_v7  ;;  %v271_v17 = vld [vmem:[#allocation2 + $0xd0] sm:$0xff]  ;;  %v286_v18 = vld [vmem:[#allocation2 + $0x148] sm:$0xff]  ;;  %v285_v21 = vld [vmem:[#allocation2 + $0x140] sm:$0xff]  ;;  %p664_p8 = scmp.ne.s32.totalorder %s662_s16, %s663_s11  ;;  %p669_p1 = scmp.lt.s32.totalorder %s667_s6, %s663_s11 }
  0x4a   : > { %315 = vmatpush.msra.mxu1 %v274_v8  ;;  %336 = vmatpush.msra.mxu2 %v289_v9  ;;  %v254_v19 = vld [vmem:[#allocation2 + $0x48] sm:$0xff]  ;;  %v253_v22 = vld [vmem:[#allocation2 + $0x40] sm:$0xff]  ;;  %v284_v24 = vld [vmem:[#allocation2 + $0x138] sm:$0xff] }
  0x4b   : > { %296 = vmatpush.msra.mxu0 %v257_v10  ;;  %v270_v20 = vld [vmem:[#allocation2 + $0xc8] sm:$0xff]  ;;  %v269_v23 = vld [vmem:[#allocation2 + $0xc0] sm:$0xff]  ;;  %v252_v25 = vld [vmem:[#allocation2 + $0x38] sm:$0xff]  ;;  %p665_p11 = pnand %p664_p8, %p781_p6  ;;  %p670_p5 = por %p669_p1, %p668_p13 }
  0x4c   : > { %316 = vmatpush.msra.mxu1 %v273_v11  ;;  %337 = vmatpush.msra.mxu2 %v288_v12  ;;  %v268_v26 = vld [vmem:[#allocation2 + $0xb8] sm:$0xff]  ;;  %v283_v27 = vld [vmem:[#allocation2 + $0x130] sm:$0xff]  ;;  %v282_v30 = vld [vmem:[#allocation2 + $0x128] sm:$0xff] }
  0x4d   : > { %297 = vmatpush.msra.mxu0 %v256_v13  ;;  %v251_v28 = vld [vmem:[#allocation2 + $0x30] sm:$0xff]  ;;  %v250_v31 = vld [vmem:[#allocation2 + $0x28] sm:$0xff]  ;;  %v281_v33 = vld [vmem:[#allocation2 + $0x120] sm:$0xff]  ;;  %p666_p12 = pneg %p665_p11 }
  0x4e   : > { %317 = vmatpush.msra.mxu1 %v272_v14  ;;  %338 = vmatpush.msra.mxu2 %v287_v15  ;;  %v267_v29 = vld [vmem:[#allocation2 + $0xb0] sm:$0xff]  ;;  %v266_v32 = vld [vmem:[#allocation2 + $0xa8] sm:$0xff]  ;;  %v249_v34 = vld [vmem:[#allocation2 + $0x20] sm:$0xff] }
  0x4f   : > { %298 = vmatpush.msra.mxu0 %v255_v16  ;;  %v265_v35 = vld [vmem:[#allocation2 + $0xa0] sm:$0xff]  ;;  %v280_v36 = vld [vmem:[#allocation2 + $0x118] sm:$0xff]  ;;  %v279_v39 = vld [vmem:[#allocation2 + $0x110] sm:$0xff]  ;;  %p671_p7 = pnand %p670_p5, %p666_p12 }
  0x50   : > { %318 = vmatpush.msra.mxu1 %v271_v17  ;;  %339 = vmatpush.msra.mxu2 %v286_v18  ;;  %v248_v37 = vld [vmem:[#allocation2 + $0x18] sm:$0xff]  ;;  %v247_v40 = vld [vmem:[#allocation2 + $0x10] sm:$0xff]  ;;  %v278_v42 = vld [vmem:[#allocation2 + $0x108] sm:$0xff] }
  0x51   : > { %299 = vmatpush.msra.mxu0 %v254_v19  ;;  %v264_v38 = vld [vmem:[#allocation2 + $0x98] sm:$0xff]  ;;  %v263_v41 = vld [vmem:[#allocation2 + $0x90] sm:$0xff]  ;;  %v246_v43 = vld [vmem:[#allocation2 + $0x8] sm:$0xff] }
  0x52   : > { %319 = vmatpush.msra.mxu1 %v270_v20  ;;  %340 = vmatpush.msra.mxu2 %v285_v21  ;;  %v262_v44 = vld [vmem:[#allocation2 + $0x88] sm:$0xff]  ;;  %v277_v45 = vld [vmem:[#allocation2 + $0x100] sm:$0xff]  ;;  %v353_v56 = vld [vmem:[%s213_s28] sm:$0xff] }
  0x53   : > { %300 = vmatpush.msra.mxu0 %v253_v22  ;;  %v245_v46 = vld [vmem:[#allocation2] sm:$0xff]  ;;  %v244_v47 = vld [vmem:[%s874_s20 + $0x10] sm:$0xff] }
  0x54   : > { %320 = vmatpush.msra.mxu1 %v269_v23  ;;  %341 = vmatpush.msra.mxu2 %v284_v24  ;;  %v261_v48 = vld [vmem:[#allocation2 + $0x80] sm:$0xff] }
  0x55   : > { %301 = vmatpush.msra.mxu0 %v252_v25  ;;  %v242_v49 = vld [vmem:[%s874_s20] sm:$0xff]  ;;  %v243_v50 = vld [vmem:[%s874_s20 + $0x8] sm:$0xff] }
  0x56   : > { %321 = vmatpush.msra.mxu1 %v268_v26  ;;  %342 = vmatpush.msra.mxu2 %v283_v27 }
  0x57   : > { %302 = vmatpush.msra.mxu0 %v251_v28 }
  0x58   : > { %322 = vmatpush.msra.mxu1 %v267_v29  ;;  %343 = vmatpush.msra.mxu2 %v282_v30 }
  0x59   : > { %303 = vmatpush.msra.mxu0 %v250_v31 }
  0x5a   : > { %323 = vmatpush.msra.mxu1 %v266_v32  ;;  %344 = vmatpush.msra.mxu2 %v281_v33 }
  0x5b   : > { %304 = vmatpush.msra.mxu0 %v249_v34 }
  0x5c   : > { %324 = vmatpush.msra.mxu1 %v265_v35  ;;  %345 = vmatpush.msra.mxu2 %v280_v36 }
  0x5d   : > { %305 = vmatpush.msra.mxu0 %v248_v37 }
  0x5e   : > { %325 = vmatpush.msra.mxu1 %v264_v38  ;;  %346 = vmatpush.msra.mxu2 %v279_v39 }
  0x5f   : > { %306 = vmatpush.msra.mxu0 %v247_v40 }
  0x60   : > { %326 = vmatpush.msra.mxu1 %v263_v41  ;;  %347 = vmatpush.msra.mxu2 %v278_v42 }
  0x61   : > { %307 = vmatpush.msra.mxu0 %v246_v43 }
  0x62   : > { %327 = vmatpush.msra.mxu1 %v262_v44  ;;  %348 = vmatpush.msra.mxu2 %v277_v45 }
  0x63   : > { %308 = vmatpush.msra.mxu0 %v245_v46  ;;  %349 = vmatmul.f32.vlgmr.msra.gmra.mxu2 %v244_v47 }
  0x64   : > { %328 = vmatpush.msra.mxu1 %v261_v48  ;;  %309 = vmatmul.f32.vlgmr.msra.gmra.mxu0 %v242_v49 }
  0x65   : > { %329 = vmatmul.f32.vlgmr.msra.gmra.mxu1 %v243_v50 }
  0xe1   : > { %v310_v51 = vpop.f32.mrf.mxu0 }
  0xe2   : > { %v330_v52 = vpop.f32.mrf.mxu1 }
  0xe3   : > { %v331_v53 = vadd.f32 %v330_v52, %v310_v51 }
  0xe6   : > { %v350_v54 = vpop.f32.mrf.mxu2 }
  0xe7   : > { %v351_v55 = vadd.f32 %v350_v54, %v331_v53 }
  0xe9   : > { %v354_v57 = vmul.f32 0.33333334, %v351_v55 }
  0xeb   : > { %v355_v58 = vmul.f32 %v354_v57, %v353_v56 }
  0xed   : > { %356 = vst [vmem:[%s241_s24] sm:$0xff] %v355_v58 }
  0xee   : > { %674 = shalt.err (!%p671_p7)
}
  0xef   : > { %501 = dma.vmem_to_hbm [thread:$0]  (%p781_p6), %s371_s29, 128, %s373_s5, %s358_s25  }
  0xf0 PF: > { %s384_s30 = sand.u32 1, %s705_s12   ;;  %p928_p9 = scmp.ge.s32.totalorder %s717_s15, 2 }
  0xf1   : > { %s385_s27 = scalar_lea.sflag [#allocation4], %s384_s30 }
  0xf2   : > { %p515_p0 = pnand %p928_p9, %p790_p10 }
  0xf4   : > { %p516_p2 = pneg %p515_p0 }
  0xf6   : > { %700 = dma.done.wait (%p516_p2), %s385_s27, 128  }
  0xf7   : > { %702 = vsyncadd (%p516_p2), %s385_s27, 4294967168  ;;  %p17_p4 = scmp.ge.s32.totalorder %s767_s18, 4   ;;  %s929_s12 = smov %s709_s13 }
  0xf8   : > { %s930_s13 = smov %s713_s14  ;;  %s931_s14 = smov %s779_s21 }
  0xf9   : > { %s932_s15 = smov %s767_s18  ;;  %19 = sbr.rel (!%p17_p4) target bundleno = 8 (0x8), region = 93 }
  0xfe   :  { %391 = vsyncpa [#allocation3], 1 }
  0xff   :  { %393 = vsyncpa [#allocation3 + $0x1], 1 }
 0x100   :  { %394 = vsyncpa [#allocation6], 1 }
 0x101   :  { %396 = vsyncpa [#allocation6 + $0x1], 1 }
 0x102   :  { %397 = vsyncpa [#allocation4], 1 }
 0x103   :  { %399 = vsyncpa [#allocation4 + $0x1], 1 }

</bundles_post_ra>
